<compile_context>
chip_gen: v5e
topology: v5e:2x2
jax: 0.10.0
libtpu: 0.0.40
codegen_flags: <defaults>
</compile_context>

<pallas_src>
import functools

import jax
import jax.numpy as jnp
from jax import lax
from jax.experimental import pallas as pl
from jax.experimental.pallas import tpu as pltpu


# ------------------------------ Pallas kernel ------------------------------

def _focus_cbs_kernel(x_ref, h0_ref, h1_ref, w_ref, scale_ref, shift_ref, o_ref,
                      *, th, wo, cin, cout):
    """Fused 3x3/s1 conv + folded-BN scale/shift + SiLU for one row block.

    x_ref:     (th, Wp, Cin)   bf16 padded rows [r*th, r*th+th)
    h0_ref:    (1,  Wp, Cin)   bf16 padded row   r*th+th        (halo)
    h1_ref:    (1,  Wp, Cin)   bf16 padded row   r*th+th+1      (halo)
    w_ref:     (9*Cin, Cout)   bf16 conv weights, (kh, kw, cin)-major ordering
    scale_ref: (1, Cout)       f32 folded-BN scale  gamma / sqrt(var+eps)
    shift_ref: (1, Cout)       f32 folded-BN shift  beta + scale*(bias-mean)
    o_ref:     (th, Wo, Cout)  output row block (bf16 by default)
    """
    # (th+2, Wp, Cin): concat along the outermost axis is just more vreg pages.
    xin = jnp.concatenate([x_ref[...], h0_ref[...], h1_ref[...]], axis=0)

    # Pack the 9 shifted taps into one (th*wo, 9*Cin) slab so the whole conv is
    # a single K=9*Cin MXU matmul (instead of 9 K=Cin matmuls + 9 acc sweeps).
    taps = []
    for kh in range(3):
        rows = xin[kh:kh + th]                      # (th, Wp, Cin)  page slice
        for kw in range(3):
            taps.append(rows[:, kw:kw + wo, :])     # (th, Wo, Cin)
    slab = jnp.concatenate(taps, axis=-1).reshape(th * wo, 9 * cin)

    acc = jnp.dot(slab, w_ref[...], preferred_element_type=jnp.float32)
    z = acc * scale_ref[...] + shift_ref[...]       # BN applied in f32 epilogue
    o = z * jax.nn.sigmoid(z)                       # SiLU (sigmoid -> EUP slot)
    o_ref[...] = o.reshape(th, wo, cout).astype(o_ref.dtype)


# ------------------------------ tiling helper ------------------------------

def _pick_row_block(ho, wo, wp, vmem_limit_bytes):
    """Largest multiple-of-8 divisor of H_out whose (lane-padded) footprint fits."""
    lanes = 128     # Cin=12 / K=108 / Cout=32 all pad to the 128-lane minor axis

    def footprint(th):
        x_blk = th * wp * lanes * 2        # bf16 main input block
        halo = 2 * wp * lanes * 2          # two 1-row halo blocks
        out_blk = th * wo * lanes * 2      # bf16 output block
        slab = th * wo * lanes * 2         # bf16 im2col slab (value, K padded)
        acc = th * wo * lanes * 4          # f32 matmul result
        return 2 * (x_blk + halo + out_blk) + slab + acc   # in/out double-buffered

    budget = int(0.6 * vmem_limit_bytes)
    divisors = [d for d in range(ho, 0, -1) if ho % d == 0]
    for require_aligned in (True, False):
        for d in divisors:
            if require_aligned and d % 8 != 0:
                continue
            if footprint(d) <= budget:
                return d
    return 1


# ------------------------------ wrapper (glue) ------------------------------

def focus_apply(params, x_nchw, *, row_block=None, out_dtype=jnp.bfloat16,
                vmem_limit_bytes=48 * 1024 * 1024):
    """Focus forward: space-to-depth slicing + fused CBS(4*Cin -> Cout, 3, 1, 1).

    Input is PyTorch-style NCHW f32; output is NCHW in `out_dtype` (bf16 default).
    """
    w, scale, shift = params["w"], params["scale"], params["shift"]
    cout = w.shape[-1]

    # Cast to bf16 FIRST so the transpose/slice/concat/pad XLA passes move half
    # the bytes; channels stay on the minor (lane) axis for the conv matmul.
    x = jnp.transpose(x_nchw.astype(jnp.bfloat16), (0, 2, 3, 1))   # NCHW -> NHWC
    # Focus slicing; channel order matches torch.cat([a, b, c, d], dim=1).
    xa = x[:, ::2, ::2, :]
    xb = x[:, 1::2, ::2, :]
    xc = x[:, ::2, 1::2, :]
    xd = x[:, 1::2, 1::2, :]
    xf = jnp.concatenate([xa, xb, xc, xd], axis=-1)                # (N,Ho,Wo,4Cin)
    n, ho, wo, cin4 = xf.shape
    xp = jnp.pad(xf, ((0, 0), (1, 1), (1, 1), (0, 0)))             # conv pad, bf16
    wp = wo + 2

    th = _pick_row_block(ho, wo, wp, vmem_limit_bytes) if row_block is None else row_block
    if ho % th != 0:
        raise ValueError(f"row_block={th} must divide H_out={ho} (rows would be dropped)")
    grid = (n, ho // th)

    kernel = functools.partial(_focus_cbs_kernel, th=th, wo=wo, cin=cin4, cout=cout)
    out = pl.pallas_call(
        kernel,
        out_shape=jax.ShapeDtypeStruct((n, ho, wo, cout), out_dtype),
        grid=grid,
        in_specs=[
            # main row block: padded rows [r*th, r*th+th)
            pl.BlockSpec((None, th, wp, cin4), lambda b, r: (b, r, 0, 0)),
            # 1-row halo blocks: padded rows r*th+th and r*th+th+1
            pl.BlockSpec((None, 1, wp, cin4), lambda b, r: (b, r * th + th, 0, 0)),
            pl.BlockSpec((None, 1, wp, cin4), lambda b, r: (b, r * th + th + 1, 0, 0)),
            # weights / BN params: full, constant index -> DMA'd once, resident
            pl.BlockSpec((9 * cin4, cout), lambda b, r: (0, 0)),
            pl.BlockSpec((1, cout), lambda b, r: (0, 0)),
            pl.BlockSpec((1, cout), lambda b, r: (0, 0)),
        ],
        out_specs=pl.BlockSpec((None, th, wo, cout), lambda b, r: (b, r, 0, 0)),
        compiler_params=pltpu.CompilerParams(
            # Row blocks only touch their own rows (no shared whole-image block),
            # so both axes are safe to shard across v7x's two TensorCores.
            dimension_semantics=("parallel", "parallel"),
            # 48 MB is v7x-safe; raise toward ~96 MB on v5e/v6e for bigger tiles.
            vmem_limit_bytes=vmem_limit_bytes,
        ),
    )(xp, xp, xp, w, scale, shift)

    # NHWC -> NCHW on the already-bf16 output (half the transpose traffic of f32).
    # TODO(synk): emit NCHW / lane-packed blocks directly from the kernel to
    #             delete this transpose and make the stores lane-dense.
    return jnp.transpose(out, (0, 3, 1, 2))


# ------------------------------ parameter init ------------------------------

def init_focus(key, in_channel=3, out_channel=32, eps=1e-5):
    cin4 = in_channel * 4
    ks = jax.random.split(key, 6)
    w = jax.random.normal(ks[0], (3, 3, cin4, out_channel), jnp.float32) / ((9 * cin4) ** 0.5)
    b = 0.1 * jax.random.normal(ks[1], (out_channel,), jnp.float32)      # conv bias
    gamma = 1.0 + 0.1 * jax.random.normal(ks[2], (out_channel,), jnp.float32)
    beta = 0.1 * jax.random.normal(ks[3], (out_channel,), jnp.float32)
    mean = 0.1 * jax.random.normal(ks[4], (out_channel,), jnp.float32)
    var = 0.9 + 0.2 * jax.random.uniform(ks[5], (out_channel,), jnp.float32)

    scale = gamma / jnp.sqrt(var + eps)                                   # folded BN scale
    shift = beta + scale * (b - mean)                                     # folded BN shift
    return {
        "w": w.reshape(9 * cin4, out_channel).astype(jnp.bfloat16),       # (kh,kw,cin)-major
        "scale": scale.reshape(1, out_channel).astype(jnp.float32),
        "shift": shift.reshape(1, out_channel).astype(jnp.float32),
    }


# ------------------------------ pure-JAX reference ------------------------------

def _reference(params, x_nchw):
    """Same math with lax.conv (HIGHEST precision) on bf16-rounded operands."""
    x = jnp.transpose(x_nchw, (0, 2, 3, 1)).astype(jnp.float32)
    xa = x[:, ::2, ::2, :]
    xb = x[:, 1::2, ::2, :]
    xc = x[:, ::2, 1::2, :]
    xd = x[:, 1::2, 1::2, :]
    xf = jnp.concatenate([xa, xb, xc, xd], axis=-1)
    xf = xf.astype(jnp.bfloat16).astype(jnp.float32)          # match kernel input rounding
    cin4 = xf.shape[-1]
    w = params["w"].astype(jnp.float32).reshape(3, 3, cin4, -1)
    y = lax.conv_general_dilated(
        xf, w, window_strides=(1, 1), padding=((1, 1), (1, 1)),
        dimension_numbers=("NHWC", "HWIO", "NHWC"),
        precision=lax.Precision.HIGHEST)
    z = y * params["scale"].reshape(1, 1, 1, -1) + params["shift"].reshape(1, 1, 1, -1)
    o = z * jax.nn.sigmoid(z)
    return jnp.transpose(o, (0, 3, 1, 2))


# ------------------------------ main ------------------------------

if __name__ == "__main__":
    in_channel, out_channel = 3, 32
    n, h, w = 2, 16, 16

    params = init_focus(jax.random.PRNGKey(0), in_channel, out_channel)
    x = jax.random.normal(jax.random.PRNGKey(0), (n, in_channel, h, w), jnp.float32)

    fwd = jax.jit(lambda inp: focus_apply(params, inp))
    out = fwd(x)
    jax.block_until_ready(out)

    assert out.shape == (n, out_channel, h // 2, w // 2), out.shape
    assert out.dtype == jnp.bfloat16, out.dtype
    out_f32 = out.astype(jnp.float32)
    assert bool(jnp.all(jnp.isfinite(out_f32)))

    ref = _reference(params, x)
    max_err = float(jnp.max(jnp.abs(out_f32 - ref)))
    assert max_err < 5e-2, f"max abs error vs reference: {max_err}"

    print("KERNEL_OK")
</pallas_src>

<mosaic_0001>
module attributes {stable_mosaic.version = 11 : i64} {
  func.func @_focus_cbs_kernel(%arg0: i32, %arg1: i32, %arg2: memref<1x8x10x12xbf16, #tpu.memory_space<vmem>>, %arg3: memref<1x1x10x12xbf16, #tpu.memory_space<vmem>>, %arg4: memref<1x1x10x12xbf16, #tpu.memory_space<vmem>>, %arg5: memref<108x32xbf16, #tpu.memory_space<vmem>>, %arg6: memref<1x32xf32, #tpu.memory_space<vmem>>, %arg7: memref<1x32xf32, #tpu.memory_space<vmem>>, %arg8: memref<1x8x8x32xbf16, #tpu.memory_space<vmem>>) attributes {dimension_semantics = [#tpu.dimension_semantics<parallel>, #tpu.dimension_semantics<parallel>], iteration_bounds = array<i64: 2, 1>, scalar_prefetch = 0 : i64, scratch_operands = 0 : i64, tpu.core_type = #tpu.core_type<tc>, window_params = [{transform_indices = @transform_0, window_bounds = array<i64: 1, 8, 10, 12>}, {transform_indices = @transform_1, window_bounds = array<i64: 1, 1, 10, 12>}, {transform_indices = @transform_2, window_bounds = array<i64: 1, 1, 10, 12>}, {pipeline_mode = #tpu.pipeline_mode<synchronous>, transform_indices = @transform_3, window_bounds = array<i64: 108, 32>}, {pipeline_mode = #tpu.pipeline_mode<synchronous>, transform_indices = @transform_4, window_bounds = array<i64: 1, 32>}, {pipeline_mode = #tpu.pipeline_mode<synchronous>, transform_indices = @transform_5, window_bounds = array<i64: 1, 32>}, {transform_indices = @transform_6, window_bounds = array<i64: 1, 8, 8, 32>}]} {
    %c0 = arith.constant 0 : index
    %c0_0 = arith.constant 0 : index
    %c0_1 = arith.constant 0 : index
    %c0_2 = arith.constant 0 : index
    %0 = vector.load %arg2[%c0, %c0_0, %c0_1, %c0_2] : memref<1x8x10x12xbf16, #tpu.memory_space<vmem>>, vector<1x8x10x12xbf16>
    %1 = vector.shape_cast %0 : vector<1x8x10x12xbf16> to vector<8x10x12xbf16>
    %c0_3 = arith.constant 0 : index
    %c0_4 = arith.constant 0 : index
    %c0_5 = arith.constant 0 : index
    %c0_6 = arith.constant 0 : index
    %2 = vector.load %arg3[%c0_3, %c0_4, %c0_5, %c0_6] : memref<1x1x10x12xbf16, #tpu.memory_space<vmem>>, vector<1x1x10x12xbf16>
    %3 = vector.shape_cast %2 : vector<1x1x10x12xbf16> to vector<1x10x12xbf16>
    %c0_7 = arith.constant 0 : index
    %c0_8 = arith.constant 0 : index
    %c0_9 = arith.constant 0 : index
    %c0_10 = arith.constant 0 : index
    %4 = vector.load %arg4[%c0_7, %c0_8, %c0_9, %c0_10] : memref<1x1x10x12xbf16, #tpu.memory_space<vmem>>, vector<1x1x10x12xbf16>
    %5 = vector.shape_cast %4 : vector<1x1x10x12xbf16> to vector<1x10x12xbf16>
    %6 = tpu.concatenate %1, %3, %5 in 0 : vector<8x10x12xbf16>, vector<1x10x12xbf16>, vector<1x10x12xbf16> -> vector<10x10x12xbf16>
    %7 = vector.extract_strided_slice %6 {offsets = [0, 0, 0], sizes = [8, 10, 12], strides = [1, 1, 1]} : vector<10x10x12xbf16> to vector<8x10x12xbf16>
    %8 = vector.extract_strided_slice %7 {offsets = [0, 0, 0], sizes = [8, 8, 12], strides = [1, 1, 1]} : vector<8x10x12xbf16> to vector<8x8x12xbf16>
    %9 = vector.extract_strided_slice %7 {offsets = [0, 1, 0], sizes = [8, 8, 12], strides = [1, 1, 1]} : vector<8x10x12xbf16> to vector<8x8x12xbf16>
    %10 = vector.extract_strided_slice %7 {offsets = [0, 2, 0], sizes = [8, 8, 12], strides = [1, 1, 1]} : vector<8x10x12xbf16> to vector<8x8x12xbf16>
    %11 = vector.extract_strided_slice %6 {offsets = [1, 0, 0], sizes = [8, 10, 12], strides = [1, 1, 1]} : vector<10x10x12xbf16> to vector<8x10x12xbf16>
    %12 = vector.extract_strided_slice %11 {offsets = [0, 0, 0], sizes = [8, 8, 12], strides = [1, 1, 1]} : vector<8x10x12xbf16> to vector<8x8x12xbf16>
    %13 = vector.extract_strided_slice %11 {offsets = [0, 1, 0], sizes = [8, 8, 12], strides = [1, 1, 1]} : vector<8x10x12xbf16> to vector<8x8x12xbf16>
    %14 = vector.extract_strided_slice %11 {offsets = [0, 2, 0], sizes = [8, 8, 12], strides = [1, 1, 1]} : vector<8x10x12xbf16> to vector<8x8x12xbf16>
    %15 = vector.extract_strided_slice %6 {offsets = [2, 0, 0], sizes = [8, 10, 12], strides = [1, 1, 1]} : vector<10x10x12xbf16> to vector<8x10x12xbf16>
    %16 = vector.extract_strided_slice %15 {offsets = [0, 0, 0], sizes = [8, 8, 12], strides = [1, 1, 1]} : vector<8x10x12xbf16> to vector<8x8x12xbf16>
    %17 = vector.extract_strided_slice %15 {offsets = [0, 1, 0], sizes = [8, 8, 12], strides = [1, 1, 1]} : vector<8x10x12xbf16> to vector<8x8x12xbf16>
    %18 = vector.extract_strided_slice %15 {offsets = [0, 2, 0], sizes = [8, 8, 12], strides = [1, 1, 1]} : vector<8x10x12xbf16> to vector<8x8x12xbf16>
    %19 = tpu.concatenate %8, %9, %10, %12, %13, %14, %16, %17, %18 in 2 : vector<8x8x12xbf16>, vector<8x8x12xbf16>, vector<8x8x12xbf16>, vector<8x8x12xbf16>, vector<8x8x12xbf16>, vector<8x8x12xbf16>, vector<8x8x12xbf16>, vector<8x8x12xbf16>, vector<8x8x12xbf16> -> vector<8x8x108xbf16>
    %20 = vector.shape_cast %19 : vector<8x8x108xbf16> to vector<64x108xbf16>
    %c0_11 = arith.constant 0 : index
    %c0_12 = arith.constant 0 : index
    %21 = vector.load %arg5[%c0_11, %c0_12] : memref<108x32xbf16, #tpu.memory_space<vmem>>, vector<108x32xbf16>
    %cst = arith.constant dense<0.000000e+00> : vector<64x32xf32>
    %22 = tpu.matmul %20, %21, %cst {dimension_numbers = #tpu.dot_dimension_numbers<[1], [0], [0], [1], [0, 0, 1, 1], [], []>} : vector<64x108xbf16>, vector<108x32xbf16>, vector<64x32xf32> -> vector<64x32xf32>
    %c0_13 = arith.constant 0 : index
    %c0_14 = arith.constant 0 : index
    %23 = vector.load %arg6[%c0_13, %c0_14] : memref<1x32xf32, #tpu.memory_space<vmem>>, vector<1x32xf32>
    %24 = vector.broadcast %23 : vector<1x32xf32> to vector<64x32xf32>
    %25 = arith.mulf %22, %24 : vector<64x32xf32>
    %c0_15 = arith.constant 0 : index
    %c0_16 = arith.constant 0 : index
    %26 = vector.load %arg7[%c0_15, %c0_16] : memref<1x32xf32, #tpu.memory_space<vmem>>, vector<1x32xf32>
    %27 = vector.broadcast %26 : vector<1x32xf32> to vector<64x32xf32>
    %28 = arith.addf %25, %27 : vector<64x32xf32>
    %29 = arith.negf %28 : vector<64x32xf32>
    %30 = math.exp %29 : vector<64x32xf32>
    %cst_17 = arith.constant 1.000000e+00 : f32
    %31 = vector.broadcast %cst_17 : f32 to vector<64x32xf32>
    %32 = arith.addf %31, %30 : vector<64x32xf32>
    %33 = arith.divf %31, %32 : vector<64x32xf32>
    %34 = arith.mulf %28, %33 : vector<64x32xf32>
    %35 = vector.shape_cast %34 : vector<64x32xf32> to vector<8x8x32xf32>
    %36 = arith.truncf %35 : vector<8x8x32xf32> to vector<8x8x32xbf16>
    %c0_18 = arith.constant 0 : index
    %c0_19 = arith.constant 0 : index
    %c0_20 = arith.constant 0 : index
    %c0_21 = arith.constant 0 : index
    %37 = vector.load %arg8[%c0_18, %c0_19, %c0_20, %c0_21] : memref<1x8x8x32xbf16, #tpu.memory_space<vmem>>, vector<1x8x8x32xbf16>
    %38 = vector.shape_cast %37 : vector<1x8x8x32xbf16> to vector<8x8x32xbf16>
    %39 = vector.shape_cast %36 : vector<8x8x32xbf16> to vector<1x8x8x32xbf16>
    tpu.vector_store %arg8[%c0_18, %c0_19, %c0_20, %c0_21], %39 {strides = array<i32>} : memref<1x8x8x32xbf16, #tpu.memory_space<vmem>>, vector<1x8x8x32xbf16>,
    return
  }
  func.func @transform_0(%arg0: i32, %arg1: i32) -> (i32, i32, i32, i32) {
    %c0_i32 = arith.constant 0 : i32
    %c0_i32_0 = arith.constant 0 : i32
    %c0_i32_1 = arith.constant 0 : i32
    return %arg0, %arg1, %c0_i32, %c0_i32_0 : i32, i32, i32, i32
  }
  func.func @transform_1(%arg0: i32, %arg1: i32) -> (i32, i32, i32, i32) {
    %c8_i32 = arith.constant 8 : i32
    %0 = arith.muli %arg1, %c8_i32 : i32
    %c8_i32_0 = arith.constant 8 : i32
    %1 = arith.addi %0, %c8_i32_0 : i32
    %c0_i32 = arith.constant 0 : i32
    %c0_i32_1 = arith.constant 0 : i32
    %c0_i32_2 = arith.constant 0 : i32
    return %arg0, %1, %c0_i32, %c0_i32_1 : i32, i32, i32, i32
  }
  func.func @transform_2(%arg0: i32, %arg1: i32) -> (i32, i32, i32, i32) {
    %c8_i32 = arith.constant 8 : i32
    %0 = arith.muli %arg1, %c8_i32 : i32
    %c8_i32_0 = arith.constant 8 : i32
    %1 = arith.addi %0, %c8_i32_0 : i32
    %c1_i32 = arith.constant 1 : i32
    %2 = arith.addi %1, %c1_i32 : i32
    %c0_i32 = arith.constant 0 : i32
    %c0_i32_1 = arith.constant 0 : i32
    %c0_i32_2 = arith.constant 0 : i32
    return %arg0, %2, %c0_i32, %c0_i32_1 : i32, i32, i32, i32
  }
  func.func @transform_3(%arg0: i32, %arg1: i32) -> (i32, i32) {
    %c0_i32 = arith.constant 0 : i32
    %c0_i32_0 = arith.constant 0 : i32
    %c0_i32_1 = arith.constant 0 : i32
    return %c0_i32, %c0_i32_0 : i32, i32
  }
  func.func @transform_4(%arg0: i32, %arg1: i32) -> (i32, i32) {
    %c0_i32 = arith.constant 0 : i32
    %c0_i32_0 = arith.constant 0 : i32
    %c0_i32_1 = arith.constant 0 : i32
    return %c0_i32, %c0_i32_0 : i32, i32
  }
  func.func @transform_5(%arg0: i32, %arg1: i32) -> (i32, i32) {
    %c0_i32 = arith.constant 0 : i32
    %c0_i32_0 = arith.constant 0 : i32
    %c0_i32_1 = arith.constant 0 : i32
    return %c0_i32, %c0_i32_0 : i32, i32
  }
  func.func @transform_6(%arg0: i32, %arg1: i32) -> (i32, i32, i32, i32) {
    %c0_i32 = arith.constant 0 : i32
    %c0_i32_0 = arith.constant 0 : i32
    %c0_i32_1 = arith.constant 0 : i32
    return %arg0, %arg1, %c0_i32, %c0_i32_0 : i32, i32, i32, i32
  }
}

</mosaic_0001>

<bundles_post_ra>
// kernel: _lambda_.1
= control target key start
LH: loop header
LB: loop body
LE: loop exit
PB: predicated region body
PF: predicated region fallthrough
CT: control target
= control target key end

     0   :  { %11 = vsyncpa [#allocation3], 0  ;;  %s2155_s0 = inlined_call_operand.vmem [shape: bf16[2,10,10,12], index: 0, kind: input, shape index: {}, may-alias: {0,1,2}]   ;;  %s2156_s1 = inlined_call_operand.vmem [shape: bf16[2,10,10,12], index: 1, kind: input, shape index: {}, may-alias: {0,1,2}]   ;;  %s2157_s2 = inlined_call_operand.vmem [shape: bf16[2,10,10,12], index: 2, kind: input, shape index: {}, may-alias: {0,1,2}]   ;;  %s2158_s3 = inlined_call_operand.vmem [shape: bf16[108,32], index: 3, kind: input, shape index: {}]   ;;  %s2159_s4 = inlined_call_operand.vmem [shape: f32[1,32], index: 4, kind: input, shape index: {}]   ;;  %s2160_s5 = inlined_call_operand.vmem [shape: f32[1,32], index: 5, kind: input, shape index: {}]   ;;  %s2161_s6 = inlined_call_operand.hbm [shape: bf16[2,8,8,32], index: 6, kind: output, shape index: {}]  }
   0x1   :  { %13 = vsyncpa [#allocation3 + $0x1], 0  ;;  %s1620_s21 = smov 0   ;;  %s1622_s22 = smov 0  }
   0x2   :  { %s1624_s23 = smov 0   ;;  %s1626_s24 = smov 0  }
   0x3   :  { %s1628_s25 = smov 0   ;;  %s1630_s26 = smov 0  }
   0x4 LB: > { %s1301_s27 = sadd.s32 4294967295, %s1573_s26   ;;  %s1302_s28 = sadd.s32 4294967294, %s1573_s26   ;;  %s1573_s26 = sphi %s1630_s26, %s19_s26   ;;  %s1569_s25 = sphi %s1628_s25, %s2168_s25   ;;  %s1565_s24 = sphi %s1626_s24, %s2167_s24   ;;  %s1561_s23 = sphi %s1624_s23, %s2166_s23   ;;  %s1557_s22 = sphi %s1622_s22, %s2165_s22   ;;  %s1553_s21 = sphi %s1620_s21, %s2164_s21  }
   0x5   : > { %s31_s29 = sadd.s32 1, %s1569_s25  ;;  %s195_s30 = sadd.s32 1, %s1561_s23 }
   0x6   : > { %p33_p0 = scmp.ge.s32.totalorder %s31_s29, 2  ;;  %p205_p1 = scmp.ne.s32.totalorder %s1561_s23, %s1557_s22 }
   0x7   : > { %p206_p2 = scmp.eq.s32.totalorder %s1301_s27, 1  ;;  %p211_p3 = scmp.ne.s32.totalorder %s1557_s22, %s1553_s21 }
   0x8   : > { %s2170_s29 = smov (%p33_p0, %s31_s29), 0  ;;  %p212_p5 = scmp.eq.s32.totalorder %s1302_s28, 1 }
   0x9   : > { %p1660_p4 = por %p206_p2, %p205_p1  ;;  %s190_s8 = ssub.s32 %s1569_s25, %s2170_s29 }
   0xa   : > { %p1305_p6 = scmp.ge.s32.totalorder %s1573_s26, 1  ;;  %p193_p7 = scmp.eq.s32.totalorder %s190_s8, 0 }
   0xb   : > { %p1667_p8 = por %p212_p5, %p211_p3  ;;  %p295_p9 = scmp.lt.s32.totalorder %s1573_s26, 3 }
   0xc   : > { %s1673_s10 = scalar_select %p193_p7, %s1561_s23, %s195_s30  }
   0xd   : > { %p296_p10 = pnand %p1305_p6, %p295_p9 }
   0xe   : > { %p363_p11 = scmp.lt.s32.totalorder (!%p296_p10), %s1565_s24, 1  ;;  %s1575_s16 = smov (!%p296_p10), 24  }
   0xf   : > { %299 = sbr.rel (%p296_p10) target bundleno = 495 (0x1ef), region = 44  ;;  %s1576_s17 = smov (!%p296_p10), 12  }
  0x10   : > { %s1577_s28 = smov (!%p296_p10), 36   ;;  %s1578_s30 = smov (!%p296_p10), 48  }
  0x11   : > { %s1579_s8 = smov (!%p296_p10), 60   ;;  %s1581_s19 = smov (!%p296_p10), 84  }
  0x14   : > { %s364_s11 = scalar_select %p363_p11, %s1565_s24, 1  ;;  %vm693_vm0 = vcmask 97280   ;;  %vm718_vm1 = vcmask 195584   ;;  %vm735_vm2 = vcmask 293888   ;;  %vm925_vm3 = vcmask 1045504  }
  0x15   : > { %vm752_vm4 = vcmask 392192   ;;  %vm769_vm5 = vcmask 490496   ;;  %vm786_vm6 = vcmask 588800   ;;  %vm803_vm7 = vcmask 687104  }
  0x16   : > { %s1677_s12 = smul.u32 80, %s364_s11  ;;  %vm820_vm8 = vcmask 785408   ;;  %vm912_vm9 = vcmask 883712   ;;  %vm1150_vm14 = vcmask 257024  }
  0x18   : > { %s1683_s15 = scalar_lea.vmem %s2155_s0, %s1677_s12  ;;  %s1360_s18 = sadd.s32 64, %s1677_s12 }
  0x19   : > { %v1686_v0 = vld [vmem:[%s1683_s15 + $0x38] sm:$0xf]  ;;  %v421_v1 = vld [vmem:[%s1683_s15 + $0x3c] sm:$0x1]  ;;  %v1690_v2 = vld [vmem:[%s1683_s15 + $0x30] sm:$0xf]  ;;  %s388_s27 = scalar_lea.vmem %s2156_s1, %s1360_s18 }
  0x1a   : > { %v456_v3 = vunpack.c.l.b16 %v1686_v0  ;;  %v457_v4 = vunpack.c.l.b16 %v421_v1  ;;  %v419_v5 = vld [vmem:[%s1683_s15 + $0x34] sm:$0x1]  ;;  %v454_v6 = vunpack.c.l.b16 %v1690_v2  ;;  %v1696_v7 = vld [vmem:[%s1683_s15 + $0x20] sm:$0xf]  ;;  %v415_v8 = vld [vmem:[%s1683_s15 + $0x24] sm:$0x1] }
  0x1b   : > { %v455_v9 = vunpack.c.l.b16 %v419_v5  ;;  %v1700_v10 = vunpack.c.l.b16 %v1696_v7  ;;  %v451_v11 = vunpack.c.l.b16 %v415_v8  ;;  %v1703_v12 = vld [vmem:[%s1683_s15 + $0x28] sm:$0xf]  ;;  %v417_v13 = vld [vmem:[%s1683_s15 + $0x2c] sm:$0x1]  ;;  %v422_v41 = vld [vmem:[%s388_s27] sm:$0xf] }
  0x1c   : > { %v465_v14 = vpack.c.b16 %v457_v4, %v456_v3  ;;  %v452_v17 = vunpack.c.l.b16 %v1703_v12  ;;  %v453_v18 = vunpack.c.l.b16 %v417_v13  ;;  %v423_v42 = vld [vmem:[%s388_s27 + $0x4] sm:$0x1]  ;;  %v563_v43 = vunpack.c.l.b16 %v422_v41  ;;  %v1768_v53 = vld [vmem:[%s1683_s15 + $0x8] sm:$0xf]  ;;  %v409_v54 = vld [vmem:[%s1683_s15 + $0xc] sm:$0x1] }
  0x1d   : > { %v464_v15 = vpack.c.b16 %v455_v9, %v454_v6  ;;  %v462_v16 = vpack.c.b16 %v451_v11, %v1700_v10  ;;  %v570_v44 = vpack.c.b16 %v456_v3, %v456_v3  ;;  %v569_v45 = vpack.c.b16 %v454_v6, %v454_v6  ;;  %s1362_s11 = sadd.s32 72, %s1677_s12  ;;  %v1775_v55 = vld [vmem:[%s1683_s15 + $0x10] sm:$0xf]  ;;  %v411_v56 = vld [vmem:[%s1683_s15 + $0x14] sm:$0x1]  ;;  %s1580_s12 = smov 72  }
  0x1e   : > { %v1708_v19 = vrot.slane %v465_v14, 1  ;;  %v463_v27 = vpack.c.b16 %v453_v18, %v452_v17  ;;  %v518_v30 = vshll.u32 %v465_v14, 16  ;;  %v516_v34 = vshrl.u32 %v465_v14, 16  ;;  %s401_s18 = scalar_lea.vmem %s2157_s2, %s1362_s11  ;;  %v1312_v60 = vld [vmem:[%s1683_s15] sm:$0xf]  ;;  %s354_s11 = sand.u32 1, %s1557_s22  }
  0x1f   : > { %v1710_v20 = vrot.slane %v464_v15, 1  ;;  %v511_v21 = vshll.u32 %v464_v15, 16  ;;  %v509_v22 = vshrl.u32 %v464_v15, 16  ;;  %v497_v23 = vshll.u32 %v462_v16, 16  ;;  %v1363_v61 = vld [vmem:[%s1683_s15] sm:$0x10] }
  0x20   : > { %560 = vrot.lane.b32.xlu1 %v1708_v19, %s1575_s16  ;;  %v1714_v24 = vrot.slane %v462_v16, 1  ;;  %v495_v26 = vshrl.u32 %v462_v16, 16  ;;  %v504_v32 = vshll.u32 %v463_v27, 16  ;;  %v1724_v33 = vrot.slane %v463_v27, 1  ;;  %v424_v1 = vld [vmem:[%s401_s18] sm:$0xf] }
  0x21   : > { %558 = vrot.lane.b32.xlu0 %v1710_v20, %s1575_s16  ;;  %v513_v25 = vrot.slane %v511_v21, 1  ;;  %v499_v28 = vrot.slane %v497_v23, 1  ;;  %v520_v35 = vrot.slane %v518_v30, 1  ;;  %v502_v36 = vshrl.u32 %v463_v27, 16  ;;  %v1800_v6 = vld [vmem:[%s1683_s15 + $0x18] sm:$0xf] }
  0x22   : > { %554 = vrot.lane.b32.xlu2 %v1714_v24, %s1575_s16  ;;  %v506_v37 = vrot.slane %v504_v32, 1  ;;  %v1740_v40 = vpack.c.b16 %v452_v17, %v452_v17  ;;  %v589_v46 = vunpack.c.l.b16 %v423_v42  ;;  %v571_v47 = vpack.c.b16 %v563_v43, %v563_v43  ;;  %v413_v8 = vld [vmem:[%s1683_s15 + $0x1c] sm:$0x1]  ;;  %s1306_s13 = sshll.u32 %s354_s11, 5 }
  0x23   : > { %v1720_v29 = vor.u32 %v513_v25, %v509_v22  ;;  %v1722_v31 = vor.u32 %v499_v28, %v495_v26  ;;  %v1733_v38 = vor.u32 %v520_v35, %v516_v34  ;;  %v1780_v58 = vunpack.c.l.b16 %v1768_v53  ;;  %v425_v25 = vld [vmem:[%s401_s18 + $0x4] sm:$0x1]  ;;  %s2075_s14 = scalar_lea.vmem [#allocation2], %s1306_s13  ;;  %s1371_s18 = sshll.u32 %s1565_s24, 5 }
  0x24   : > { %v1738_v39 = vor.u32 %v506_v37, %v502_v36  ;;  %v1750_v48 = vpack.c.b16 %v589_v46, %v563_v43  ;;  %v445_v59 = vunpack.c.l.b16 %v409_v54  ;;  %v1788_v62 = vunpack.c.l.b16 %v1775_v55  ;;  %s1174_s24 = sshll.u32 %s2075_s14, 4  ;;  %s1175_s24 = int_to_ptr.vmem [resolvable:$true] %s1174_s24 }
  0x25   : > { %v447_v63 = vunpack.c.l.b16 %v411_v56  ;;  %v1313_v4 = vor.u32 %v1363_v61, %v1312_v60  ;;  %v632_v5 = vunpack.c.l.b16 %v424_v1  ;;  %v448_v14 = vunpack.c.l.b16 %v1800_v6 }
  0x26   : > { %v594_v49 = vshll.u32 %v1750_v48, 16  ;;  %v592_v50 = vshrl.u32 %v1750_v48, 16  ;;  %v614_v57 = vrot.slane %v1750_v48, 1  ;;  %v1794_v3 = vpack.c.b16 %v445_v59, %v1780_v58 }
  0x27   : > { %v460_v9 = vpack.c.b16 %v447_v63, %v1788_v62  ;;  %v469_v13 = vshll.u32 %v1313_v4, 16  ;;  %v449_v15 = vunpack.c.l.b16 %v413_v8  ;;  %v633_v16 = vpack.c.b16 %v632_v5, %v632_v5 }
  0x28   : > { %534 = vrot.lane.b32.xlu1 %v1720_v29, %s1576_s17  ;;  %v596_v51 = vrot.slane %v594_v49, 1  ;;  %v476_v11 = vshll.u32 %v1794_v3, 16  ;;  %v474_v18 = vshrl.u32 %v1794_v3, 16  ;;  %v467_v22 = vshrl.u32 %v1313_v4, 16 }
  0x29   : > { %530 = vrot.lane.b32.xlu0 %v1722_v31, %s1576_s17  ;;  %v483_v17 = vshll.u32 %v460_v9, 16  ;;  %v471_v23 = vrot.slane %v469_v13, 1  ;;  %v461_v26 = vpack.c.b16 %v449_v15, %v448_v14  ;;  %v481_v27 = vshrl.u32 %v460_v9, 16 }
  0x2a   : > { %556 = vrot.lane.b32.xlu2 %v1724_v33, %s1575_s16  ;;  %v1761_v52 = vor.u32 %v596_v51, %v592_v50  ;;  %v478_v21 = vrot.slane %v476_v11, 1  ;;  %v651_v32 = vunpack.c.l.b16 %v425_v25  ;;  %v538_v49 = vrot.slane %v1313_v4, 1 }
  0x2b   : > { %v485_v28 = vrot.slane %v483_v17, 1  ;;  %v472_v34 = vor.u32 %v471_v23, %v467_v22  ;;  %v490_v35 = vshll.u32 %v461_v26, 16  ;;  %v488_v41 = vshrl.u32 %v461_v26, 16 }
  0x2c   : > { %v479_v30 = vor.u32 %v478_v21, %v474_v18  ;;  %v652_v37 = vpack.c.b16 %v651_v32, %v632_v5  ;;  %v1828_v50 = vrot.slane %v460_v9, 1  ;;  %v1831_v51 = vrot.slane %v461_v26, 1  ;;  %v1370_v26 = vld [vmem:[%s2158_s3 + $0x30] sm:$0x30]  ;;  %v1369_v32 = vld [vmem:[%s2158_s3 + $0x28] sm:$0xff] }
  0x2d   : > { %v1810_v36 = vor.u32 %v485_v28, %v481_v27  ;;  %v492_v42 = vrot.slane %v490_v35, 1  ;;  %v565_v59 = vpack.c.b16 %v1788_v62, %v1788_v62  ;;  %v566_v48 = vpack.c.b16 %v448_v14, %v448_v14  ;;  %v1368_v35 = vld [vmem:[%s2158_s3 + $0x20] sm:$0xff] }
  0x2e   : > { %v656_v43 = vshll.u32 %v652_v37, 16  ;;  %v676_v56 = vrot.slane %v652_v37, 1 }
  0x30   : > { %536 = vrot.lane.b32.xlu1 %v1733_v38, %s1576_s17  ;;  %v658_v46 = vrot.slane %v656_v43, 1  ;;  %v1365_v43 = vld [vmem:[%s2158_s3 + $0x8] sm:$0xff] }
  0x31   : > { %532 = vrot.lane.b32.xlu0 %v1738_v39, %s1576_s17 }
  0x32   : > { %580 = vrot.lane.b32.xlu2 %v1740_v40, %s1577_s28 }
  0x38   : > { %584 = vrot.lane.b32.xlu1 %v570_v44, %s1577_s28 }
  0x39   : > { %582 = vrot.lane.b32.xlu0 %v569_v45, %s1577_s28 }
  0x3a   : > { %586 = vrot.lane.b32.xlu2 %v571_v47, %s1577_s28 }
  0x40   : > { %608 = vrot.lane.b32.xlu1 %v1720_v29, %s1578_s30 }
  0x41   : > { %606 = vrot.lane.b32.xlu0 %v1738_v39, %s1578_s30 }
  0x42   : > { %610 = vrot.lane.b32.xlu2 %v1733_v38, %s1578_s30 }
  0x48   : > { %623 = vrot.lane.b32.xlu1 %v1724_v33, %s1579_s8 }
  0x49   : > { %612 = vrot.lane.b32.xlu0 %v1761_v52, %s1578_s30 }
  0x4a   : > { %625 = vrot.lane.b32.xlu2 %v1710_v20, %s1579_s8 }
  0x50   : > { %629 = vrot.lane.b32.xlu1 %v614_v57, %s1579_s8 }
  0x51   : > { %627 = vrot.lane.b32.xlu0 %v1708_v19, %s1579_s8 }
  0x52   : > { %642 = vrot.lane.b32.xlu2 %v569_v45, %s1580_s12  ;;  %v654_v45 = vshrl.u32 %v652_v37, 16  ;;  %v1367_v37 = vld [vmem:[%s2158_s3 + $0x18] sm:$0xff] }
  0x58   : > { %646 = vrot.lane.b32.xlu1 %v571_v47, %s1580_s12  ;;  %v659_v47 = vor.u32 %v658_v46, %v654_v45 }
  0x59   : > { %644 = vrot.lane.b32.xlu0 %v570_v44, %s1580_s12  ;;  %v1816_v44 = vor.u32 %v492_v42, %v488_v41  ;;  %v1366_v42 = vld [vmem:[%s2158_s3 + $0x10] sm:$0xff] }
  0x5a   : > { %648 = vrot.lane.b32.xlu2 %v633_v16, %s1580_s12 }
  0x60   : > { %524 = vrot.lane.b32.xlu1 %v479_v30, %s1576_s17 }
  0x61   : > { %522 = vrot.lane.b32.xlu0 %v472_v34, %s1576_s17 }
  0x62   : > { %526 = vrot.lane.b32.xlu2 %v1810_v36, %s1576_s17 }
  0x68   : > { %668 = vrot.lane.b32.xlu1 %v1720_v29, %s1581_s19  ;;  %v539_v29 = vrot.slane %v1794_v3, 1 }
  0x69   : > { %528 = vrot.lane.b32.xlu0 %v1816_v44, %s1576_s17  ;;  %s1582_s17 = smov 96  }
  0x6a   : > { %670 = vrot.lane.b32.xlu2 %v1733_v38, %s1581_s19 }
  0x70   : > { %674 = vrot.lane.b32.xlu1 %v659_v47, %s1581_s19 }
  0x71   : > { %672 = vrot.lane.b32.xlu0 %v1761_v52, %s1581_s19  ;;  %v564_v52 = vpack.c.b16 %v1780_v58, %v1780_v58 }
  0x72   : > { %546 = vrot.lane.b32.xlu2 %v538_v49, %s1575_s16  ;;  %v1364_v49 = vld [vmem:[%s2158_s3] sm:$0xff] }
  0x78   : > { %550 = vrot.lane.b32.xlu1 %v1828_v50, %s1575_s16 }
  0x79   : > { %548 = vrot.lane.b32.xlu0 %v539_v29, %s1575_s16 }
  0x7a   : > { %552 = vrot.lane.b32.xlu2 %v1831_v51, %s1575_s16  ;;  %s1173_s16 = scalar_lea.hbm %s2161_s6, %s1371_s18 }
  0x7b   : > { %s1176_s20 = sshll.u32 %s1173_s16, 4  ;;  %s1177_s20 = int_to_ptr.hbm [resolvable:$true] %s1176_s20 }
  0x7c   : > { %v555_v38 = vpop.permute.xlu2 %554  ;;  %s1509_s27 = sshra.s32 %s1177_s20, 4  ;;  %s1510_s27 = int_to_ptr.hbm [resolvable:$true] %s1509_s27 }
  0x7d   : > { %p1516_p1 = scmp.lt.s32.totalorder %s1510_s27, %s2161_s6 }
  0x80   : > { %687 = vrot.lane.b32.xlu1 %v1708_v19, %s1582_s17  ;;  %v567_v19 = vpack.c.b16 %v1700_v10, %v1700_v10 }
  0x81   : > { %685 = vrot.lane.b32.xlu0 %v1710_v20, %s1582_s17 }
  0x82   : > { %689 = vrot.lane.b32.xlu2 %v614_v57, %s1582_s17 }
  0x84   : > { %v557_v54 = vpop.permute.xlu2 %556 }
  0x88   : > { %572 = vrot.lane.b32.xlu1 %v564_v52, %s1577_s28 }
  0x89   : > { %691 = vrot.lane.b32.xlu0 %v676_v56, %s1582_s17 }
  0x8a   : > { %574 = vrot.lane.b32.xlu2 %v565_v59, %s1577_s28 }
  0x8c   : > { %v581_v20 = vpop.permute.xlu2 %580 }
  0x90   : > { %578 = vrot.lane.b32.xlu1 %v567_v19, %s1577_s28 }
  0x91   : > { %576 = vrot.lane.b32.xlu0 %v566_v48, %s1577_s28 }
  0x92   : > { %v561_v57 = vpop.permute.xlu1 %560  ;;  %598 = vrot.lane.b32.xlu2 %v479_v30, %s1578_s30 }
  0x93   : > { %v559_v58 = vpop.permute.xlu0 %558 }
  0x94   : > { %v587_v60 = vpop.permute.xlu2 %586 }
  0x98   : > { %602 = vrot.lane.b32.xlu1 %v1816_v44, %s1578_s30 }
  0x99   : > { %600 = vrot.lane.b32.xlu0 %v1810_v36, %s1578_s30 }
  0x9a   : > { %v535_v10 = vpop.permute.xlu1 %534  ;;  %604 = vrot.lane.b32.xlu2 %v1722_v31, %s1578_s30 }
  0x9b   : > { %v714_v61 = vsel %vm693_vm0, %v1690_v2, %v535_v10  ;;  %v531_v62 = vpop.permute.xlu0 %530 }
  0x9c   : > { %v708_v63 = vsel %vm693_vm0, %v1696_v7, %v531_v62  ;;  %v1867_v1 = vpop.permute.xlu2 %610  ;;  %v732_v3 = vsel %vm718_vm1, %v714_v61, %v559_v58 }
  0x9d   : > { %v728_v4 = vsel %vm718_vm1, %v708_v63, %v555_v38 }
  0x9e   : > { %v1872_v5 = vsel %vm735_vm2, %v728_v4, %v581_v20 }
  0xa0   : > { %617 = vrot.lane.b32.xlu1 %v1828_v50, %s1579_s8 }
  0xa1   : > { %615 = vrot.lane.b32.xlu0 %v539_v29, %s1579_s8 }
  0xa2   : > { %v537_v2 = vpop.permute.xlu1 %536  ;;  %619 = vrot.lane.b32.xlu2 %v1831_v51, %s1579_s8 }
  0xa3   : > { %v717_v7 = vsel %vm693_vm0, %v1686_v0, %v537_v2  ;;  %v533_v8 = vpop.permute.xlu0 %532 }
  0xa4   : > { %v734_v9 = vsel %vm718_vm1, %v717_v7, %v561_v57  ;;  %v711_v11 = vsel %vm693_vm0, %v1703_v12, %v533_v8  ;;  %v1884_v13 = vpop.permute.xlu2 %625 }
  0xa5   : > { %v730_v14 = vsel %vm718_vm1, %v711_v11, %v557_v54  ;;  %v1888_v15 = vsel %vm735_vm2, %v734_v9, %v587_v60 }
  0xa8   : > { %634 = vrot.lane.b32.xlu1 %v565_v59, %s1580_s12 }
  0xa9   : > { %621 = vrot.lane.b32.xlu0 %v1714_v24, %s1579_s8  ;;  %s1515_s8 = scalar_lea.hbm %s2161_s6, 64 }
  0xaa   : > { %v585_v16 = vpop.permute.xlu1 %584  ;;  %636 = vrot.lane.b32.xlu2 %v566_v48, %s1580_s12 }
  0xab   : > { %v1895_v0 = vsel %vm735_vm2, %v732_v3, %v585_v16  ;;  %v583_v17 = vpop.permute.xlu0 %582 }
  0xac   : > { %v1898_v12 = vsel %vm735_vm2, %v730_v14, %v583_v17  ;;  %v1900_v18 = vpop.permute.xlu2 %642  ;;  %v766_v9 = vsel %vm752_vm4, %v1895_v0, %v1867_v1 }
  0xb0   : > { %640 = vrot.lane.b32.xlu1 %v1740_v40, %s1580_s12  ;;  %v1340_v40 = vld [vmem:[%s2158_s3 + $0x30] sm:$0xf] }
  0xb1   : > { %638 = vrot.lane.b32.xlu0 %v567_v19, %s1580_s12  ;;  %v1341_v28 = vor.u32 %v1370_v26, %v1340_v40 }
  0xb2   : > { %v1905_v21 = vpop.permute.xlu1 %608  ;;  %660 = vrot.lane.b32.xlu2 %v1810_v36, %s1581_s19 }
  0xb3   : > { %v1909_v22 = vpop.permute.xlu0 %606  ;;  %v927_v30 = vsel %vm925_vm3, %v1341_v28, 0  ;;  %v764_v57 = vsel %vm752_vm4, %v1898_v12, %v1905_v21 }
  0xb4   : > { %v1911_v23 = vpop.permute.xlu2 %648  ;;  %1373 = vmatpush.bf16.msra.mxu2 %v927_v30  ;;  %1374 = vmatpush.bf16.msra.mxu3 %v927_v30  ;;  %v762_v61 = vsel %vm752_vm4, %v1872_v5, %v1909_v22 }
  0xb5   : > { %930 = vmatpush.bf16.msra.mxu0 %v927_v30  ;;  %1372 = vmatpush.bf16.msra.mxu1 %v927_v30 }
  0xb8   : > { %664 = vrot.lane.b32.xlu1 %v1722_v31, %s1581_s19  ;;  %1376 = vmatpush.bf16.msra.mxu2 %v1369_v32 }
  0xb9   : > { %662 = vrot.lane.b32.xlu0 %v1816_v44, %s1581_s19  ;;  %1377 = vmatpush.bf16.msra.mxu3 %v1369_v32 }
  0xba   : > { %v1917_v25 = vpop.permute.xlu1 %623  ;;  %666 = vrot.lane.b32.xlu2 %v1738_v39, %s1581_s19  ;;  %931 = vmatpush.bf16.msra.mxu0 %v1369_v32 }
  0xbb   : > { %v1927_v27 = vpop.permute.xlu0 %612  ;;  %1375 = vmatpush.bf16.msra.mxu1 %v1369_v32  ;;  %v779_v62 = vsel %vm769_vm5, %v762_v61, %v1917_v25 }
  0xbc   : > { %v527_v31 = vpop.permute.xlu2 %526  ;;  %1379 = vmatpush.bf16.msra.mxu2 %v1368_v35  ;;  %v796_v3 = vsel %vm786_vm6, %v779_v62, %v1900_v18  ;;  %v768_v17 = vsel %vm752_vm4, %v1888_v15, %v1927_v27 }
  0xbd   : > { %1380 = vmatpush.bf16.msra.mxu3 %v1368_v35  ;;  %v702_v20 = vsel %vm693_vm0, %v1775_v55, %v527_v31  ;;  %v781_v55 = vsel %vm769_vm5, %v764_v57, %v1884_v13 }
  0xbe   : > { %932 = vmatpush.bf16.msra.mxu0 %v1368_v35 }
  0xbf   : > { %1378 = vmatpush.bf16.msra.mxu1 %v1368_v35 }
  0xc0   : > { %679 = vrot.lane.b32.xlu1 %v1831_v51, %s1582_s17  ;;  %1382 = vmatpush.bf16.msra.mxu2 %v1367_v37 }
  0xc1   : > { %677 = vrot.lane.b32.xlu0 %v1828_v50, %s1582_s17  ;;  %1383 = vmatpush.bf16.msra.mxu3 %v1367_v37 }
  0xc2   : > { %v1936_v39 = vpop.permute.xlu1 %629  ;;  %681 = vrot.lane.b32.xlu2 %v1714_v24, %s1582_s17  ;;  %933 = vmatpush.bf16.msra.mxu0 %v1367_v37 }
  0xc3   : > { %v1940_v34 = vpop.permute.xlu0 %627  ;;  %1381 = vmatpush.bf16.msra.mxu1 %v1367_v37  ;;  %v785_v18 = vsel %vm769_vm5, %v768_v17, %v1936_v39 }
  0xc4   : > { %v671_v36 = vpop.permute.xlu2 %670  ;;  %1385 = vmatpush.bf16.msra.mxu2 %v1366_v42  ;;  %v783_v14 = vsel %vm769_vm5, %v766_v9, %v1940_v34  ;;  %v802_v21 = vsel %vm786_vm6, %v785_v18, %v1911_v23  ;;  %v2048_v18 = vld [vmem:[%s2159_s4] ss:$0 sm:$0xff] }
  0xc5   : > { %1386 = vmatpush.bf16.msra.mxu3 %v1366_v42 }
  0xc6   : > { %934 = vmatpush.bf16.msra.mxu0 %v1366_v42 }
  0xc7   : > { %1384 = vmatpush.bf16.msra.mxu1 %v1366_v42 }
  0xc8   : > { %1388 = vmatpush.bf16.msra.mxu2 %v1365_v43 }
  0xc9   : > { %683 = vrot.lane.b32.xlu0 %v1724_v33, %s1582_s17  ;;  %v406_v33 = vld [vmem:[%s1683_s15] sm:$0xf]  ;;  %1389 = vmatpush.bf16.msra.mxu3 %v1365_v43  ;;  %s1160_s17 = scalar_lea.sflag [#allocation3], %s354_s11  ;;  %s1511_s15 = scalar_lea.hbm %s1510_s27, 32 }
  0xca   : > { %v1950_v24 = vpop.permute.xlu1 %646  ;;  %935 = vmatpush.bf16.msra.mxu0 %v1365_v43  ;;  %p1512_p12 = scmp.ne.s32.totalorder %s1510_s27, %s1511_s15  ;;  %p1517_p2 = scmp.lt.s32.totalorder %s1515_s8, %s1511_s15 }
  0xcb   : > { %v645_v41 = vpop.permute.xlu0 %644  ;;  %1387 = vmatpush.bf16.msra.mxu1 %v1365_v43  ;;  %v800_v12 = vsel %vm786_vm6, %v783_v14, %v1950_v24 }
  0xcc   : > { %v547_v44 = vpop.permute.xlu2 %546  ;;  %1391 = vmatpush.bf16.msra.mxu2 %v1364_v49  ;;  %v798_v63 = vsel %vm786_vm6, %v781_v55, %v645_v41  ;;  %p1513_p13 = pnand %p1512_p12, %p1660_p4  ;;  %p1518_p3 = por %p1517_p2, %p1516_p1 }
  0xcd   : > { %1392 = vmatpush.bf16.msra.mxu3 %v1364_v49 }
  0xce   : > { %936 = vmatpush.bf16.msra.mxu0 %v1364_v49  ;;  %p1514_p0 = pneg %p1513_p13 }
  0xcf   : > { %1390 = vmatpush.bf16.msra.mxu1 %v1364_v49 }
  0xd0   : > { %p1519_p5 = pnand %p1518_p3, %p1514_p0 }
  0xd2   : > { %v525_v45 = vpop.permute.xlu1 %524 }
  0xd3   : > { %v523_v46 = vpop.permute.xlu0 %522  ;;  %v699_v58 = vsel %vm693_vm0, %v1768_v53, %v525_v45  ;;  %v815_v53 = vsel %vm803_vm7, %v798_v63, %v671_v36 }
  0xd4   : > { %v696_v47 = vsel %vm693_vm0, %v406_v33, %v523_v46  ;;  %v553_v51 = vpop.permute.xlu2 %552 }
  0xd5   : > { %v1964_v50 = vsel %vm718_vm1, %v696_v47, %v547_v44 }
  0xda   : > { %v669_v29 = vpop.permute.xlu1 %668 }
  0xdb   : > { %v529_v38 = vpop.permute.xlu0 %528  ;;  %v813_v2 = vsel %vm803_vm7, %v796_v3, %v669_v29 }
  0xdc   : > { %v705_v52 = vsel %vm693_vm0, %v1800_v6, %v529_v38  ;;  %v690_v19 = vpop.permute.xlu2 %689 }
  0xdd   : > { %v1969_v54 = vsel %vm718_vm1, %v705_v52, %v553_v51 }
  0xe2   : > { %v675_v56 = vpop.permute.xlu1 %674 }
  0xe3   : > { %v673_v59 = vpop.permute.xlu0 %672  ;;  %v819_v15 = vsel %vm803_vm7, %v802_v21, %v675_v56 }
  0xe4   : > { %v575_v5 = vpop.permute.xlu2 %574  ;;  %v817_v1 = vsel %vm803_vm7, %v800_v12, %v673_v59 }
  0xe5   : > { %v834_v22 = vsel %vm820_vm8, %v817_v1, %v690_v19  ;;  %v2053_v1 = vld [vmem:[%s2160_s5] ss:$0 sm:$0xff] }
  0xe6   : > { %v865_v28 = vunpack.c.l.b16 %v834_v22 }
  0xea   : > { %v551_v48 = vpop.permute.xlu1 %550 }
  0xeb   : > { %v1979_v6 = vsel %vm718_vm1, %v702_v20, %v551_v48  ;;  %v549_v60 = vpop.permute.xlu0 %548 }
  0xec   : > { %v722_v10 = vsel %vm718_vm1, %v699_v58, %v549_v60  ;;  %v599_v26 = vpop.permute.xlu2 %598 }
  0xed   : > { %v739_v29 = vsel %vm735_vm2, %v722_v10, %v575_v5 }
  0xf2   : > { %v688_v4 = vpop.permute.xlu1 %687 }
  0xf3   : > { %v832_v7 = vsel %vm820_vm8, %v815_v53, %v688_v4  ;;  %v686_v8 = vpop.permute.xlu0 %685 }
  0xf4   : > { %v864_v11 = vunpack.c.l.b16 %v832_v7  ;;  %v830_v13 = vsel %vm820_vm8, %v813_v2, %v686_v8  ;;  %v605_v34 = vpop.permute.xlu2 %604 }
  0xf5   : > { %v863_v16 = vunpack.c.l.b16 %v830_v13 }
  0xf7   : > { %v869_v0 = vpack.c.b16 %v864_v11, %v863_v16 }
  0xf9   : > { %1344 = vmatmul.msk.bf16.vlgmr.msra.gmra.mxu2 %vm912_vm9, %v869_v0 }
  0xfa   : > { %v573_v25 = vpop.permute.xlu1 %572 }
  0xfb   : > { %v692_v40 = vpop.permute.xlu0 %691  ;;  %v737_v47 = vsel %vm735_vm2, %v1964_v50, %v573_v25 }
  0xfc   : > { %v836_v27 = vsel %vm820_vm8, %v819_v15, %v692_v40  ;;  %v620_v23 = vpop.permute.xlu2 %619  ;;  %v754_v52 = vsel %vm752_vm4, %v737_v47, %v599_v26 }
  0xfd   : > { %v866_v31 = vunpack.c.l.b16 %v836_v27 }
  0xff   : > { %v870_v30 = vpack.c.b16 %v866_v31, %v865_v28 }
 0x101   : > { %1345 = vmatmul.msk.bf16.vlgmr.msra.gmra.mxu3 %vm912_vm9, %v870_v30 }
 0x102   : > { %v579_v32 = vpop.permute.xlu1 %578 }
 0x103   : > { %v577_v39 = vpop.permute.xlu0 %576  ;;  %v743_v60 = vsel %vm735_vm2, %v1969_v54, %v579_v32 }
 0x104   : > { %v637_v41 = vpop.permute.xlu2 %636  ;;  %v741_v20 = vsel %vm735_vm2, %v1979_v6, %v577_v39  ;;  %v760_v3 = vsel %vm752_vm4, %v743_v60, %v605_v34 }
 0x10a   : > { %v603_v35 = vpop.permute.xlu1 %602 }
 0x10b   : > { %v601_v36 = vpop.permute.xlu0 %600  ;;  %v758_v50 = vsel %vm752_vm4, %v741_v20, %v603_v35 }
 0x10c   : > { %v661_v33 = vpop.permute.xlu2 %660  ;;  %v756_v51 = vsel %vm752_vm4, %v739_v29, %v601_v36  ;;  %v775_v6 = vsel %vm769_vm5, %v758_v50, %v620_v23 }
 0x112   : > { %v618_v37 = vpop.permute.xlu1 %617 }
 0x113   : > { %v616_v24 = vpop.permute.xlu0 %615  ;;  %v773_v56 = vsel %vm769_vm5, %v756_v51, %v618_v37 }
 0x114   : > { %v667_v38 = vpop.permute.xlu2 %666  ;;  %v771_v59 = vsel %vm769_vm5, %v754_v52, %v616_v24  ;;  %v790_v48 = vsel %vm786_vm6, %v773_v56, %v637_v41 }
 0x11a   : > { %v635_v42 = vpop.permute.xlu1 %634 }
 0x11b   : > { %v622_v43 = vpop.permute.xlu0 %621  ;;  %v788_v19 = vsel %vm786_vm6, %v771_v59, %v635_v42 }
 0x11c   : > { %v805_v10 = vsel %vm803_vm7, %v788_v19, %v661_v33  ;;  %v777_v2 = vsel %vm769_vm5, %v760_v3, %v622_v43  ;;  %v682_v54 = vpop.permute.xlu2 %681 }
 0x122   : > { %v641_v44 = vpop.permute.xlu1 %640 }
 0x123   : > { %v639_v45 = vpop.permute.xlu0 %638  ;;  %v794_v8 = vsel %vm786_vm6, %v777_v2, %v641_v44 }
 0x124   : > { %v792_v4 = vsel %vm786_vm6, %v775_v6, %v639_v45  ;;  %v811_v11 = vsel %vm803_vm7, %v794_v8, %v667_v38 }
 0x12a   : > { %v665_v46 = vpop.permute.xlu1 %664 }
 0x12b   : > { %v663_v49 = vpop.permute.xlu0 %662  ;;  %v809_v5 = vsel %vm803_vm7, %v792_v4, %v665_v46 }
 0x12c   : > { %v807_v57 = vsel %vm803_vm7, %v790_v48, %v663_v49  ;;  %v826_v9 = vsel %vm820_vm8, %v809_v5, %v682_v54 }
 0x12d   : > { %v861_v16 = vunpack.c.l.b16 %v826_v9 }
 0x132   : > { %v680_v58 = vpop.permute.xlu1 %679 }
 0x133   : > { %v824_v61 = vsel %vm820_vm8, %v807_v57, %v680_v58  ;;  %v678_v55 = vpop.permute.xlu0 %677 }
 0x134   : > { %v860_v62 = vunpack.c.l.b16 %v824_v61  ;;  %v822_v63 = vsel %vm820_vm8, %v805_v10, %v678_v55 }
 0x135   : > { %v859_v53 = vunpack.c.l.b16 %v822_v63 }
 0x137   : > { %v867_v7 = vpack.c.b16 %v860_v62, %v859_v53 }
 0x139   : > { %1342 = vmatmul.msk.bf16.vlgmr.msra.gmra.mxu0 %vm912_vm9, %v867_v7 }
 0x13b   : > { %v684_v13 = vpop.permute.xlu0 %683 }
 0x13c   : > { %v828_v14 = vsel %vm820_vm8, %v811_v11, %v684_v13 }
 0x13d   : > { %v862_v17 = vunpack.c.l.b16 %v828_v14 }
 0x13f   : > { %v868_v12 = vpack.c.b16 %v862_v17, %v861_v16 }
 0x141   : > { %1343 = vmatmul.msk.bf16.vlgmr.msra.gmra.mxu1 %vm912_vm9, %v868_v12 }
 0x17c   : > { %v948_v0 = vpop.f32.mrf.mxu2 }
 0x17d   : > { %v966_v21 = vmul.f32 %v2048_v18, %v948_v0 }
 0x17f   : > { %v978_v22 = vadd.f32 %v2053_v1, %v966_v21 }
 0x181   : > { %v1350_v25 = vmul.f32 -1.442695, %v978_v22 }
 0x183   : > { %1463 = vpow2.f32 %v1350_v25 }
 0x184   : > { %v950_v15 = vpop.f32.mrf.mxu2  ;;  %v953_v40 = vpop.f32.mrf.mxu3 }
 0x185   : > { %v967_v26 = vmul.f32 %v2048_v18, %v950_v15  ;;  %v968_v27 = vmul.f32 %v2048_v18, %v953_v40 }
 0x187   : > { %v2060_v28 = vadd.f32 %v2053_v1, %v967_v26  ;;  %v2063_v31 = vadd.f32 %v2053_v1, %v968_v27 }
 0x189   : > { %v1464_v30 = vpop.eup %1463  ;;  %v1351_v32 = vmul.f32 -1.442695, %v2060_v28  ;;  %v1352_v39 = vmul.f32 -1.442695, %v2063_v31 }
 0x18a   : > { %v1010_v34 = vadd.f32 1.0, %v1464_v30 }
 0x18b   : > { %1465 = vpow2.f32 %v1351_v32 }
 0x18c   : > { %1467 = vrcp.f32 %v1010_v34  ;;  %v955_v35 = vpop.f32.mrf.mxu3  ;;  %v1085_v46 = vand.u32 2147483648, %v1010_v34  ;;  %v1083_v49 = vand.u32 2147483647, %v1010_v34  ;;  %vm1079_vm11 = vweird.f32 %v1010_v34 }
 0x18d   : > { %1469 = vpow2.f32 %v1352_v39  ;;  %v969_v36 = vmul.f32 %v2048_v18, %v955_v35 }
 0x18e   : > { %v1086_v52 = vor.u32 1.1754944e-38, %v1085_v46  ;;  %vm1084_vm13 = vcmp.eq.f32.partialorder %v1083_v49, 8.507059e+37 }
 0x18f   : > { %v2069_v23 = vadd.f32 %v2053_v1, %v969_v36 }
 0x191   : > { %v1466_v37 = vpop.eup %1465  ;;  %v1353_v24 = vmul.f32 -1.442695, %v2069_v23 }
 0x192   : > { %v1468_v41 = vpop.eup %1467  ;;  %v1011_v42 = vadd.f32 1.0, %v1466_v37 }
 0x193   : > { %v1470_v43 = vpop.eup %1469  ;;  %v1075_v44 = vmul.f32 %v1468_v41, %v1010_v34  ;;  %1471 = vpow2.f32 %v1353_v24  ;;  %vm1080_vm10 = vweird.f32 %v1468_v41 }
 0x194   : > { %1473 = vrcp.f32 %v1011_v42  ;;  %v1012_v45 = vadd.f32 1.0, %v1470_v43  ;;  %vm1081_vm12 = vmor %vm1079_vm11, %vm1080_vm10  ;;  %v1100_v58 = vand.u32 2147483648, %v1011_v42  ;;  %v1098_v55 = vand.u32 2147483647, %v1011_v42 }
 0x195   : > { %v1076_v33 = vsub.f32 1.0, %v1075_v44  ;;  %vm1094_vm0 = vweird.f32 %v1011_v42 }
 0x196   : > { %1475 = vrcp.f32 %v1012_v45  ;;  %v1115_v6 = vand.u32 2147483648, %v1012_v45  ;;  %v1101_v3 = vor.u32 1.1754944e-38, %v1100_v58  ;;  %v1113_v2 = vand.u32 2147483647, %v1012_v45 }
 0x197   : > { %v1077_v47 = vmul.f32 %v1468_v41, %v1076_v33  ;;  %vm1099_vm3 = vcmp.eq.f32.partialorder %v1098_v55, 8.507059e+37  ;;  %vm1109_vm4 = vweird.f32 %v1012_v45 }
 0x198   : > { %v1116_v11 = vor.u32 1.1754944e-38, %v1115_v6  ;;  %vm1114_vm6 = vcmp.eq.f32.partialorder %v1113_v2, 8.507059e+37 }
 0x199   : > { %v1472_v29 = vpop.eup %1471  ;;  %v1078_v51 = vadd.f32 %v1468_v41, %v1077_v47 }
 0x19a   : > { %v1474_v38 = vpop.eup %1473  ;;  %v1013_v56 = vadd.f32 1.0, %v1472_v29 }
 0x19b   : > { %v1082_v59 = vsel %vm1081_vm12, %v1468_v41, %v1078_v51  ;;  %v1090_v19 = vmul.f32 %v1474_v38, %v1011_v42  ;;  %vm1095_vm15 = vweird.f32 %v1474_v38 }
 0x19c   : > { %v1087_v20 = vsel %vm1084_vm13, %v1086_v52, %v1082_v59  ;;  %1477 = vrcp.f32 %v1013_v56  ;;  %v1476_v48 = vpop.eup %1475  ;;  %vm1096_vm1 = vmor %vm1094_vm0, %vm1095_vm15  ;;  %v1128_v16 = vand.u32 2147483647, %v1013_v56  ;;  %v1130_v17 = vand.u32 2147483648, %v1013_v56 }
 0x19d   : > { %v1138_v50 = vmul.f32 %v1087_v20, %v978_v22  ;;  %v1091_v57 = vsub.f32 1.0, %v1090_v19  ;;  %v1105_v60 = vmul.f32 %v1476_v48, %v1012_v45  ;;  %vm1110_vm2 = vweird.f32 %v1476_v48 }
 0x19e   : > { %vm1111_vm5 = vmor %vm1109_vm4, %vm1110_vm2  ;;  %vm1124_vm8 = vweird.f32 %v1013_v56  ;;  %v1131_v40 = vor.u32 1.1754944e-38, %v1130_v17  ;;  %vm1129_vm10 = vcmp.eq.f32.partialorder %v1128_v16, 8.507059e+37 }
 0x19f   : > { %v1146_v10 = vpack.c.bf16 %v1138_v50, %v1138_v50  ;;  %v1092_v61 = vmul.f32 %v1474_v38, %v1091_v57  ;;  %v1106_v62 = vsub.f32 1.0, %v1105_v60 }
 0x1a1   : > { %1155 = vst.msk [vmem:[%s2075_s14 + $0x10] sm:$0xf] %vm1150_vm14, %v1146_v10  ;;  %v1093_v63 = vadd.f32 %v1474_v38, %v1092_v61  ;;  %v1107_v4 = vmul.f32 %v1476_v48, %v1106_v62 }
 0x1a2   : > { %v1478_v53 = vpop.eup %1477 }
 0x1a3   : > { %v1097_v5 = vsel %vm1096_vm1, %v1474_v38, %v1093_v63  ;;  %v1120_v54 = vmul.f32 %v1478_v53, %v1013_v56  ;;  %v1108_v8 = vadd.f32 %v1476_v48, %v1107_v4  ;;  %vm1125_vm7 = vweird.f32 %v1478_v53 }
 0x1a4   : > { %v1102_v7 = vsel %vm1099_vm3, %v1101_v3, %v1097_v5  ;;  %vm1126_vm9 = vmor %vm1124_vm8, %vm1125_vm7 }
 0x1a5   : > { %v1139_v9 = vmul.f32 %v1102_v7, %v2060_v28  ;;  %v1121_v13 = vsub.f32 1.0, %v1120_v54  ;;  %v1112_v14 = vsel %vm1111_vm5, %v1476_v48, %v1108_v8 }
 0x1a6   : > { %v1117_v0 = vsel %vm1114_vm6, %v1116_v11, %v1112_v14 }
 0x1a7   : > { %v1147_v12 = vpack.c.bf16 %v1139_v9, %v1139_v9  ;;  %v1122_v21 = vmul.f32 %v1478_v53, %v1121_v13  ;;  %v1140_v22 = vmul.f32 %v1117_v0, %v2063_v31 }
 0x1a9   : > { %1156 = vst.msk [vmem:[%s2075_s14 + $0x14] sm:$0xf] %vm1150_vm14, %v1147_v12  ;;  %v1123_v25 = vadd.f32 %v1478_v53, %v1122_v21  ;;  %v1148_v15 = vpack.c.bf16 %v1140_v22, %v1140_v22 }
 0x1ab   : > { %v1127_v26 = vsel %vm1126_vm9, %v1478_v53, %v1123_v25  ;;  %1157 = vst.msk [vmem:[%s2075_s14 + $0x18] sm:$0xf] %vm1150_vm14, %v1148_v15 }
 0x1ac   : > { %v1132_v27 = vsel %vm1129_vm10, %v1131_v40, %v1127_v26 }
 0x1ad   : > { %v1141_v28 = vmul.f32 %v1132_v27, %v2069_v23 }
 0x1af   : > { %v1149_v30 = vpack.c.bf16 %v1141_v28, %v1141_v28 }
 0x1b1   : > { %1158 = vst.msk [vmem:[%s2075_s14 + $0x1c] sm:$0xf] %vm1150_vm14, %v1149_v30 }
 0x1b6   : > { %v938_v32 = vpop.f32.mrf.mxu0 }
 0x1b7   : > { %v962_v31 = vmul.f32 %v2048_v18, %v938_v32 }
 0x1b9   : > { %v974_v39 = vadd.f32 %v2053_v1, %v962_v31 }
 0x1bb   : > { %v1346_v34 = vmul.f32 -1.442695, %v974_v39 }
 0x1bd   : > { %1479 = vpow2.f32 %v1346_v34 }
 0x1be   : > { %v940_v35 = vpop.f32.mrf.mxu0  ;;  %v943_v36 = vpop.f32.mrf.mxu1 }
 0x1bf   : > { %v963_v37 = vmul.f32 %v2048_v18, %v940_v35  ;;  %v964_v24 = vmul.f32 %v2048_v18, %v943_v36 }
 0x1c1   : > { %v2093_v41 = vadd.f32 %v2053_v1, %v963_v37  ;;  %v2096_v23 = vadd.f32 %v2053_v1, %v964_v24 }
 0x1c3   : > { %v1480_v42 = vpop.eup %1479  ;;  %v1347_v43 = vmul.f32 -1.442695, %v2093_v41  ;;  %v1348_v44 = vmul.f32 -1.442695, %v2096_v23 }
 0x1c4   : > { %v1006_v33 = vadd.f32 1.0, %v1480_v42 }
 0x1c5   : > { %1481 = vpow2.f32 %v1347_v43 }
 0x1c6   : > { %1483 = vrcp.f32 %v1006_v33  ;;  %v945_v45 = vpop.f32.mrf.mxu1  ;;  %v1025_v20 = vand.u32 2147483648, %v1006_v33  ;;  %v1023_v50 = vand.u32 2147483647, %v1006_v33  ;;  %vm1019_vm12 = vweird.f32 %v1006_v33 }
 0x1c7   : > { %1485 = vpow2.f32 %v1348_v44  ;;  %v965_v46 = vmul.f32 %v2048_v18, %v945_v45 }
 0x1c8   : > { %v1026_v58 = vor.u32 1.1754944e-38, %v1025_v20  ;;  %vm1024_vm15 = vcmp.eq.f32.partialorder %v1023_v50, 8.507059e+37 }
 0x1c9   : > { %v2102_v47 = vadd.f32 %v2053_v1, %v965_v46 }
 0x1cb   : > { %v1482_v49 = vpop.eup %1481  ;;  %v1349_v29 = vmul.f32 -1.442695, %v2102_v47 }
 0x1cc   : > { %v1484_v51 = vpop.eup %1483  ;;  %v1007_v38 = vadd.f32 1.0, %v1482_v49 }
 0x1cd   : > { %v1486_v52 = vpop.eup %1485  ;;  %v1015_v56 = vmul.f32 %v1484_v51, %v1006_v33  ;;  %1487 = vpow2.f32 %v1349_v29  ;;  %vm1020_vm11 = vweird.f32 %v1484_v51 }
 0x1ce   : > { %1489 = vrcp.f32 %v1007_v38  ;;  %v1008_v19 = vadd.f32 1.0, %v1486_v52  ;;  %vm1021_vm13 = vmor %vm1019_vm12, %vm1020_vm11  ;;  %v1040_v53 = vand.u32 2147483648, %v1007_v38  ;;  %v1038_v5 = vand.u32 2147483647, %v1007_v38 }
 0x1cf   : > { %v1016_v59 = vsub.f32 1.0, %v1015_v56  ;;  %vm1034_vm1 = vweird.f32 %v1007_v38 }
 0x1d0   : > { %1491 = vrcp.f32 %v1008_v19  ;;  %v1055_v8 = vand.u32 2147483648, %v1008_v19  ;;  %v1041_v11 = vor.u32 1.1754944e-38, %v1040_v53  ;;  %v1053_v14 = vand.u32 2147483647, %v1008_v19 }
 0x1d1   : > { %v1017_v48 = vmul.f32 %v1484_v51, %v1016_v59  ;;  %vm1039_vm4 = vcmp.eq.f32.partialorder %v1038_v5, 8.507059e+37  ;;  %vm1049_vm5 = vweird.f32 %v1008_v19 }
 0x1d2   : > { %v1056_v22 = vor.u32 1.1754944e-38, %v1055_v8  ;;  %vm1054_vm7 = vcmp.eq.f32.partialorder %v1053_v14, 8.507059e+37 }
 0x1d3   : > { %v1488_v18 = vpop.eup %1487  ;;  %v1018_v57 = vadd.f32 %v1484_v51, %v1017_v48 }
 0x1d4   : > { %v1490_v1 = vpop.eup %1489  ;;  %v1009_v60 = vadd.f32 1.0, %v1488_v18 }
 0x1d5   : > { %v1022_v10 = vsel %vm1021_vm13, %v1484_v51, %v1018_v57  ;;  %v1030_v61 = vmul.f32 %v1490_v1, %v1007_v38  ;;  %vm1035_vm0 = vweird.f32 %v1490_v1 }
 0x1d6   : > { %v1027_v55 = vsel %vm1024_vm15, %v1026_v58, %v1022_v10  ;;  %1493 = vrcp.f32 %v1009_v60  ;;  %v1492_v62 = vpop.eup %1491  ;;  %vm1036_vm2 = vmor %vm1034_vm1, %vm1035_vm0  ;;  %v1068_v40 = vand.u32 2147483647, %v1009_v60  ;;  %v1070_v26 = vand.u32 2147483648, %v1009_v60 }
 0x1d7   : > { %v1134_v63 = vmul.f32 %v1027_v55, %v974_v39  ;;  %v1031_v6 = vsub.f32 1.0, %v1030_v61  ;;  %v1045_v3 = vmul.f32 %v1492_v62, %v1008_v19  ;;  %vm1050_vm3 = vweird.f32 %v1492_v62 }
 0x1d8   : > { %vm1051_vm6 = vmor %vm1049_vm5, %vm1050_vm3  ;;  %vm1064_vm9 = vweird.f32 %v1009_v60  ;;  %v1071_v34 = vor.u32 1.1754944e-38, %v1070_v26  ;;  %vm1069_vm11 = vcmp.eq.f32.partialorder %v1068_v40, 8.507059e+37 }
 0x1d9   : > { %v1142_v4 = vpack.c.bf16 %v1134_v63, %v1134_v63  ;;  %v1032_v2 = vmul.f32 %v1490_v1, %v1031_v6  ;;  %v1046_v54 = vsub.f32 1.0, %v1045_v3 }
 0x1db   : > { %1151 = vst.msk [vmem:[%s2075_s14] sm:$0xf] %vm1150_vm14, %v1142_v4  ;;  %v1033_v7 = vadd.f32 %v1490_v1, %v1032_v2  ;;  %v1047_v13 = vmul.f32 %v1492_v62, %v1046_v54 }
 0x1dc   : > { %v1494_v9 = vpop.eup %1493 }
 0x1dd   : > { %v1037_v16 = vsel %vm1036_vm2, %v1490_v1, %v1033_v7  ;;  %v1060_v17 = vmul.f32 %v1494_v9, %v1009_v60  ;;  %v1048_v0 = vadd.f32 %v1492_v62, %v1047_v13  ;;  %vm1065_vm8 = vweird.f32 %v1494_v9 }
 0x1de   : > { %v1042_v12 = vsel %vm1039_vm4, %v1041_v11, %v1037_v16  ;;  %vm1066_vm10 = vmor %vm1064_vm9, %vm1065_vm8 }
 0x1df   : > { %v1135_v21 = vmul.f32 %v1042_v12, %v2093_v41  ;;  %v1061_v25 = vsub.f32 1.0, %v1060_v17  ;;  %v1052_v15 = vsel %vm1051_vm6, %v1492_v62, %v1048_v0 }
 0x1e0   : > { %v1057_v28 = vsel %vm1054_vm7, %v1056_v22, %v1052_v15 }
 0x1e1   : > { %v1143_v27 = vpack.c.bf16 %v1135_v21, %v1135_v21  ;;  %v1062_v30 = vmul.f32 %v1494_v9, %v1061_v25  ;;  %v1136_v32 = vmul.f32 %v1057_v28, %v2096_v23 }
 0x1e3   : > { %1152 = vst.msk [vmem:[%s2075_s14 + $0x4] sm:$0xf] %vm1150_vm14, %v1143_v27  ;;  %v1063_v31 = vadd.f32 %v1494_v9, %v1062_v30  ;;  %v1144_v39 = vpack.c.bf16 %v1136_v32, %v1136_v32 }
 0x1e5   : > { %v1067_v35 = vsel %vm1066_vm10, %v1494_v9, %v1063_v31  ;;  %1153 = vst.msk [vmem:[%s2075_s14 + $0x8] sm:$0xf] %vm1150_vm14, %v1144_v39 }
 0x1e6   : > { %v1072_v36 = vsel %vm1069_vm11, %v1071_v34, %v1067_v35 }
 0x1e7   : > { %v1137_v37 = vmul.f32 %v1072_v36, %v2102_v47 }
 0x1e9   : > { %v1145_v24 = vpack.c.bf16 %v1137_v37, %v1137_v37 }
 0x1eb   : > { %1154 = vst.msk [vmem:[%s2075_s14 + $0xc] sm:$0xf] %vm1150_vm14, %v1145_v24 }
 0x1ec   : > { %1522 = shalt.err (!%p1519_p5)
}
 0x1ed   : > { %s1583_s11 = smov 64   ;;  %s1584_s14 = smov 4  }
 0x1ee   : > { %1395 = dma.vmem_to_hbm [thread:$0]  (%p1660_p4), %s1175_s24, 512, %s1177_s20, %s1160_s17, %s1583_s11, %s1583_s11, %s1584_s14  }
 0x1ef PF: > { %p1402_p6 = scmp.ge.s32.totalorder %s1573_s26, 2  ;;  %s1191_s12 = sand.u32 1, %s1553_s21  }
 0x1f0   : > { %s1192_s19 = scalar_lea.sflag [#allocation3], %s1191_s12 }
 0x1f1   : > { %p1398_p7 = pnand %p1402_p6, %p1667_p8 }
 0x1f3   : > { %p1399_p9 = pneg %p1398_p7 }
 0x1f5   : > { %1548 = dma.done.wait (%p1399_p9), %s1192_s19, 512  }
 0x1f6   : > { %1550 = vsyncadd (%p1399_p9), %s1192_s19, 4294966784  ;;  %s19_s26 = sadd.s32 1, %s1573_s26   ;;  %s2164_s21 = smov %s1557_s22 }
 0x1f7   : > { %p16_p10 = scmp.ge.s32.totalorder %s19_s26, 4   ;;  %s2165_s22 = smov %s1561_s23 }
 0x1f8   : > { %s2166_s23 = smov %s1673_s10  ;;  %s2167_s24 = smov %s1569_s25 }
 0x1f9   : > { %s2168_s25 = smov %s2170_s29  ;;  %18 = sbr.rel (!%p16_p10) target bundleno = 4 (0x4), region = 85 }
 0x1fe   :  { %1198 = vsyncpa [#allocation3], 1 }
 0x1ff   :  { %1200 = vsyncpa [#allocation3 + $0x1], 1 }

</bundles_post_ra>
